<compile_context>
chip_gen: v5e
topology: v5e:2x2
jax: 0.10.0
libtpu: 0.0.40
codegen_flags: <defaults>
</compile_context>

<pallas_src>
import numpy as np

import jax
import jax.numpy as jnp
from jax.experimental import pallas as pl
from jax.experimental.pallas import tpu as pltpu


# ~2 MiB per block: large enough to amortize per-grid-step overhead, small
# enough that 2 pipeline buffers x (input + output) fit every generation's
# default scoped VMEM (v5e 16 MiB, v6e/v7x 32 MiB).
_BLOCK_BYTE_BUDGET = 2 * 1024 * 1024


def _drop_path_kernel(x_ref, scale_ref, o_ref):
    """One grid step: (tb, tf) tile of x times the per-sample (tb, 1) f32 scale."""
    o_ref[...] = (x_ref[...] * scale_ref[...]).astype(o_ref.dtype)


def _round_up(n: int, m: int) -> int:
    return ((n + m - 1) // m) * m


def _pick_tiles(Bp: int, Fp: int, itemsize: int, sublane: int):
    """Byte-budgeted (tb, tf): divisors of the padded extents, sublane/lane aligned."""
    tb_cands = [c for c in (4096, 2048, 1024, 512, 256, 128, 64, 32, 16, 8, Bp)
                if c <= Bp and Bp % c == 0 and c % sublane == 0]
    tf_cands = [c for c in (16384, 8192, 4096, 2048, 1024, 512, 256, 128, Fp)
                if c <= Fp and Fp % c == 0 and c % 128 == 0]
    best = None
    for tb in tb_cands:
        for tf in tf_cands:
            if tb * tf * itemsize > _BLOCK_BYTE_BUDGET:
                continue
            score = (tb * tf, tf)          # maximize block bytes, prefer lane-dense tf
            if best is None or score > best[0]:
                best = (score, tb, tf)
    if best is None:                       # unreachable: sublane*128*itemsize << budget
        tb, tf = sublane, 128
    else:
        _, tb, tf = best
    # Guarantee >= 2 programs so both v7x TensorCores get work (no-op on v5e/v6e).
    if (Bp // tb) * (Fp // tf) == 1:
        if tf % 256 == 0:
            tf //= 2
        elif tb % (2 * sublane) == 0:
            tb //= 2
    return tb, tf


def drop_path(x, drop_prob: float = 0.0, training: bool = False,
              key=None, seed: int = 0, donate_x: bool = False):
    """Pallas implementation of TOSICA DropPath.forward."""
    if drop_prob == 0.0 or not training:
        return x
    keep_prob = 1.0 - drop_prob

    B = x.shape[0]
    F = int(np.prod(x.shape[1:])) if x.ndim > 1 else 1
    x2 = x.reshape(B, F)

    # Per-sample keep/drop scale in f32 (tiny: B values).  u < keep_prob keeps
    # with probability keep_prob -- same distribution as torch's
    # floor(keep_prob + U[0,1)).  Thread `key` per call-site/step to avoid
    # reusing the same mask across layers.
    if key is None:
        key = jax.random.PRNGKey(seed)
    u = jax.random.uniform(key, (B, 1), dtype=jnp.float32)
    scale = jnp.where(u < jnp.float32(keep_prob),
                      jnp.float32(1.0 / keep_prob),
                      jnp.float32(0.0))

    itemsize = jnp.dtype(x.dtype).itemsize
    sublane = max(8, 32 // max(itemsize, 1))   # 8 (f32) / 16 (bf16) / 32 (int8, fp8)
    Bp = _round_up(B, sublane)
    Fp = _round_up(F, 128)

    needs_pad = (Bp, Fp) != (B, F)
    if needs_pad:
        x2p = jnp.pad(x2, ((0, Bp - B), (0, Fp - F)))
        scale_p = jnp.pad(scale, ((0, Bp - B), (0, 0)))
        donate = False
    else:
        x2p, scale_p = x2, scale
        donate = donate_x

    tb, tf = _pick_tiles(Bp, Fp, itemsize, sublane)
    grid = (Bp // tb, Fp // tf)

    cost = pl.CostEstimate(
        flops=Bp * Fp,
        transcendentals=0,
        bytes_accessed=2 * Bp * Fp * itemsize + Bp * 4,
    )

    out = pl.pallas_call(
        _drop_path_kernel,
        out_shape=jax.ShapeDtypeStruct((Bp, Fp), x.dtype),
        grid_spec=pltpu.PrefetchScalarGridSpec(
            num_scalar_prefetch=0,
            grid=grid,
            in_specs=[
                pl.BlockSpec((tb, tf), lambda i, j: (i, j)),
                pl.BlockSpec((tb, 1), lambda i, j: (i, 0)),
            ],
            out_specs=pl.BlockSpec((tb, tf), lambda i, j: (i, j)),
        ),
        compiler_params=pltpu.CompilerParams(
            dimension_semantics=("parallel", "parallel"),
        ),
        cost_estimate=cost,
        input_output_aliases={0: 0} if donate else {},
    )(x2p, scale_p)

    if needs_pad:
        out = out[:B, :F]
    return out.reshape(x.shape)


class DropPath:
    """Mirror of the PyTorch nn.Module (no parameters)."""

    def __init__(self, drop_prob=None):
        self.drop_prob = drop_prob
        self.training = True

    def __call__(self, x, key=None, seed: int = 0):
        return drop_path(x, self.drop_prob, self.training, key=key, seed=seed)


if __name__ == "__main__":
    key = jax.random.PRNGKey(0)
    x = jax.random.normal(key, (2, 4, 16, 16), dtype=jnp.float32)

    # --- eval / drop_prob=0 path: identity ---
    mod_eval = DropPath(drop_prob=0.25)
    mod_eval.training = False
    y_eval = jax.block_until_ready(mod_eval(x))
    assert jnp.array_equal(y_eval, x), "eval path must be identity"

    # --- training path: per-sample keep (x / keep_prob) or drop (0) ---
    drop_prob = 0.25
    keep_prob = 1.0 - drop_prob
    mod = DropPath(drop_prob=drop_prob)
    mod.training = True
    y = jax.block_until_ready(mod(x, key=jax.random.PRNGKey(123)))

    y_np = np.asarray(y)
    x_np = np.asarray(x)
    for b in range(x_np.shape[0]):
        kept = x_np[b] / keep_prob
        ok_keep = np.allclose(y_np[b], kept, rtol=1e-6, atol=1e-6)
        ok_drop = np.all(y_np[b] == 0.0)
        assert ok_keep or ok_drop, f"sample {b}: output is neither kept nor dropped"

    print("KERNEL_OK")
</pallas_src>

<mosaic_0001>
module attributes {stable_mosaic.version = 11 : i64} {
  func.func @_drop_path_kernel(%arg0: i32, %arg1: i32, %arg2: memref<8x512xf32, #tpu.memory_space<vmem>>, %arg3: memref<8x1xf32, #tpu.memory_space<vmem>>, %arg4: memref<8x512xf32, #tpu.memory_space<vmem>>) attributes {dimension_semantics = [#tpu.dimension_semantics<parallel>, #tpu.dimension_semantics<parallel>], iteration_bounds = array<i64: 1, 2>, scalar_prefetch = 0 : i64, scratch_operands = 0 : i64, tpu.core_type = #tpu.core_type<tc>, window_params = [{transform_indices = @transform_0, window_bounds = array<i64: 8, 512>}, {transform_indices = @transform_1, window_bounds = array<i64: 8, 1>}, {transform_indices = @transform_2, window_bounds = array<i64: 8, 512>}]} {
    %c0 = arith.constant 0 : index
    %c0_0 = arith.constant 0 : index
    %0 = vector.load %arg2[%c0, %c0_0] : memref<8x512xf32, #tpu.memory_space<vmem>>, vector<8x512xf32>
    %c0_1 = arith.constant 0 : index
    %c0_2 = arith.constant 0 : index
    %1 = vector.load %arg3[%c0_1, %c0_2] : memref<8x1xf32, #tpu.memory_space<vmem>>, vector<8x1xf32>
    %2 = vector.broadcast %1 : vector<8x1xf32> to vector<8x512xf32>
    %3 = arith.mulf %0, %2 : vector<8x512xf32>
    %c0_3 = arith.constant 0 : index
    %c0_4 = arith.constant 0 : index
    %4 = vector.load %arg4[%c0_3, %c0_4] : memref<8x512xf32, #tpu.memory_space<vmem>>, vector<8x512xf32>
    tpu.vector_store %arg4[%c0_3, %c0_4], %3 {strides = array<i32>} : memref<8x512xf32, #tpu.memory_space<vmem>>, vector<8x512xf32>,
    return
  }
  func.func @transform_0(%arg0: i32, %arg1: i32) -> (i32, i32) {
    %c0_i32 = arith.constant 0 : i32
    return %arg0, %arg1 : i32, i32
  }
  func.func @transform_1(%arg0: i32, %arg1: i32) -> (i32, i32) {
    %c0_i32 = arith.constant 0 : i32
    %c0_i32_0 = arith.constant 0 : i32
    return %arg0, %c0_i32 : i32, i32
  }
  func.func @transform_2(%arg0: i32, %arg1: i32) -> (i32, i32) {
    %c0_i32 = arith.constant 0 : i32
    return %arg0, %arg1 : i32, i32
  }
}

</mosaic_0001>

<bundles_post_ra>
// kernel: tpu_custom_call.1
= control target key start
LH: loop header
LB: loop body
LE: loop exit
PB: predicated region body
PF: predicated region fallthrough
CT: control target
= control target key end

     0   :  { %7 = vsyncpa [#allocation3], 0  ;;  %s670_s0 = inlined_call_operand.hbm [shape: f32[8,1024], index: 0, kind: input, shape index: {}]   ;;  %s671_s1 = inlined_call_operand.vmem [shape: f32[8,1], index: 1, kind: input, shape index: {}]   ;;  %s672_s2 = inlined_call_operand.hbm [shape: f32[8,1024], index: 2, kind: output, shape index: {}]  }
   0x1   :  { %9 = vsyncpa [#allocation3 + $0x1], 0 }
   0x2   :  { %10 = vsyncpa [#allocation4], 0 }
   0x3   :  { %12 = vsyncpa [#allocation4 + $0x1], 0  ;;  %s547_s9 = smov 0   ;;  %s549_s10 = smov 0  }
   0x4   :  { %s551_s11 = smov 0   ;;  %s553_s12 = smov 0  }
   0x5   :  { %s555_s13 = smov 0   ;;  %s557_s14 = smov 0  }
   0x6 LB: > { %s335_s15 = sadd.s32 4294967295, %s529_s14   ;;  %s336_s16 = sadd.s32 4294967294, %s529_s14   ;;  %s529_s14 = sphi %s557_s14, %s18_s14   ;;  %s525_s13 = sphi %s555_s13, %s681_s13   ;;  %s521_s12 = sphi %s553_s12, %s680_s12   ;;  %s517_s11 = sphi %s551_s11, %s679_s11   ;;  %s513_s10 = sphi %s549_s10, %s678_s10   ;;  %s509_s9 = sphi %s547_s9, %s677_s9  }
   0x7   : > { %s27_s17 = sadd.s32 1, %s525_s13  ;;  %s39_s18 = sadd.s32 1, %s517_s11 }
   0x8   : > { %p28_p0 = scmp.ge.s32.totalorder %s27_s17, 2  ;;  %p46_p1 = scmp.ne.s32.totalorder %s517_s11, %s513_s10 }
   0x9   : > { %p47_p2 = scmp.eq.s32.totalorder %s529_s14, 0  ;;  %p52_p3 = scmp.ne.s32.totalorder %s513_s10, %s509_s9 }
   0xa   : > { %s683_s17 = smov (%p28_p0, %s27_s17), 0  ;;  %p53_p5 = scmp.eq.s32.totalorder %s335_s15, 0 }
   0xb   : > { %p588_p4 = por %p47_p2, %p46_p1  ;;  %s35_s20 = ssub.s32 %s525_s13, %s683_s17 }
   0xc   : > { %p104_p6 = scmp.eq.s32.totalorder %s335_s15, 1  ;;  %p37_p7 = scmp.eq.s32.totalorder %s35_s20, 0 }
   0xd   : > { %p594_p8 = por %p53_p5, %p52_p3  ;;  %p110_p10 = scmp.eq.s32.totalorder %s336_s16, 1 }
   0xe   : > { %p598_p9 = por %p104_p6, %p46_p1  ;;  %p339_p12 = scmp.ge.s32.totalorder %s529_s14, 2 }
   0xf   : > { %s603_s23 = scalar_select %p37_p7, %s517_s11, %s39_s18  }
  0x10   : > { %p605_p11 = por %p110_p10, %p52_p3  ;;  %p365_p13 = scmp.lt.s32.totalorder %s529_s14, 2 }
  0x11   : > { %s137_s25 = sand.u32 1, %s517_s11   ;;  %s351_s27 = sshll.u32 %s525_s13, 5 }
  0x12   : > { %s340_s26 = sshll.u32 %s137_s25, 5  ;;  %s148_s30 = scalar_lea.hbm %s670_s0, %s351_s27 }
  0x13   : > { %s141_s3 = scalar_lea.vmem [#allocation2], %s340_s26  ;;  %s150_s5 = sshll.u32 %s148_s30, 4  ;;  %s151_s5 = int_to_ptr.hbm [resolvable:$true] %s150_s5 }
  0x14   : > { %s152_s4 = sshll.u32 %s141_s3, 4  ;;  %p358_p0 = pnand %p365_p13, %p588_p4  ;;  %s153_s4 = int_to_ptr.vmem [resolvable:$true] %s152_s4 }
  0x15   : > { %p343_p1 = scmp.ge.s32.totalorder %s529_s14, 1  ;;  %p157_p2 = scmp.lt.s32.totalorder %s529_s14, 3 }
  0x16   : > { %s138_s6 = scalar_lea.sflag [#allocation3], %s137_s25 }
  0x17   : > { %360 = dma.hbm_to_vmem [thread:$0]  (!%p358_p0), %s151_s5, 512, %s153_s4, %s138_s6  }
  0x18   : > { %p158_p3 = pnand %p343_p1, %p157_p2 }
  0x19   : > { %s621_s7 = sand.u32 (!%p158_p3), 1, %s513_s10  }
  0x1a   : > { %161 = sbr.rel (%p158_p3) target bundleno = 157 (0x9d), region = 28  ;;  %s344_s8 = sshll.u32 (!%p158_p3), %s621_s7, 5 }
  0x1b   : > { %s164_s15 = scalar_lea.sflag (!%p158_p3), [#allocation3], %s621_s7  ;;  %s167_s16 = scalar_lea.vmem (!%p158_p3), [#allocation2], %s344_s8 }
  0x1f   : > { %500 = dma.done.wait (%p594_p8), %s164_s15, 512  }
  0x20   : > { %502 = vsyncadd (%p594_p8), %s164_s15, 4294966784  ;;  %v531_v0 = vmov 0   ;;  %v203_v1 = vld [vmem:[%s671_s1] sm:$0xff]  ;;  %s352_s20 = sshll.u32 %s521_s12, 5  ;;  %v200_v3 = vld [vmem:[%s167_s16 + $0x8] sm:$0xff]  ;;  %s192_s21 = scalar_lea.vmem [#allocation5], %s344_s8 }
  0x21   : > { %416 = vset.pattern.permute.xlu0 %v531_v0  ;;  %v199_v2 = vld [vmem:[%s167_s16] sm:$0xff]  ;;  %v201_v4 = vld [vmem:[%s167_s16 + $0x10] sm:$0xff]  ;;  %s231_s27 = scalar_lea.hbm %s672_s2, %s352_s20  ;;  %v202_v5 = vld [vmem:[%s167_s16 + $0x18] sm:$0xff]  ;;  %s233_s28 = sshll.u32 %s192_s21, 4  ;;  %s234_s28 = int_to_ptr.vmem [resolvable:$true] %s233_s28 }
  0x22   : > { %206 = vperm.xlu0 %416, %v203_v1   ;;  %s235_s29 = sshll.u32 %s231_s27, 4  ;;  %s218_s12 = scalar_lea.sflag [#allocation4], %s621_s7  ;;  %s236_s29 = int_to_ptr.hbm [resolvable:$true] %s235_s29 }
  0x23   : > { %s461_s30 = sshra.s32 %s236_s29, 4  ;;  %s467_s6 = scalar_lea.hbm %s672_s2, 64  ;;  %s462_s30 = int_to_ptr.hbm [resolvable:$true] %s461_s30 }
  0x24   : > { %s463_s3 = scalar_lea.hbm %s462_s30, 32  ;;  %p468_p7 = scmp.lt.s32.totalorder %s462_s30, %s672_s2 }
  0x25   : > { %p464_p4 = scmp.ne.s32.totalorder %s462_s30, %s463_s3  ;;  %p469_p8 = scmp.lt.s32.totalorder %s467_s6, %s463_s3 }
  0x27   : > { %p465_p5 = pnand %p464_p4, %p598_p9  ;;  %p470_p10 = por %p469_p8, %p468_p7 }
  0x29   : > { %p466_p6 = pneg %p465_p5 }
  0x2b   : > { %p471_p13 = pnand %p470_p10, %p466_p6 }
  0x94   : > { %v207_v6 = vpop.permute.xlu0 %206 }
  0x95   : > { %v209_v7 = vmul.f32 %v207_v6, %v199_v2  ;;  %v210_v8 = vmul.f32 %v207_v6, %v200_v3  ;;  %v211_v9 = vmul.f32 %v207_v6, %v201_v4  ;;  %v212_v10 = vmul.f32 %v207_v6, %v202_v5 }
  0x97   : > { %213 = vst [vmem:[%s192_s21] sm:$0xff] %v209_v7 }
  0x98   : > { %214 = vst [vmem:[%s192_s21 + $0x8] sm:$0xff] %v210_v8 }
  0x99   : > { %215 = vst [vmem:[%s192_s21 + $0x10] sm:$0xff] %v211_v9 }
  0x9a   : > { %216 = vst [vmem:[%s192_s21 + $0x18] sm:$0xff] %v212_v10 }
  0x9b   : > { %474 = shalt.err (!%p471_p13)
}
  0x9c   : > { %355 = dma.vmem_to_hbm [thread:$0]  (%p598_p9), %s234_s28, 512, %s236_s29, %s218_s12  }
  0x9d PF: > { %s247_s7 = sand.u32 1, %s509_s9   ;;  %p362_p0 = pnand %p339_p12, %p605_p11 }
  0x9e   : > { %s248_s16 = scalar_lea.sflag [#allocation4], %s247_s7 }
  0x9f   : > { %p363_p1 = pneg %p362_p0 }
  0xa1   : > { %504 = dma.done.wait (%p363_p1), %s248_s16, 512  }
  0xa2   : > { %506 = vsyncadd (%p363_p1), %s248_s16, 4294966784  ;;  %s18_s14 = sadd.s32 1, %s529_s14   ;;  %s677_s9 = smov %s513_s10 }
  0xa3   : > { %p15_p2 = scmp.ge.s32.totalorder %s18_s14, 4   ;;  %s678_s10 = smov %s517_s11 }
  0xa4   : > { %s679_s11 = smov %s603_s23  ;;  %s680_s12 = smov %s525_s13 }
  0xa5   : > { %s681_s13 = smov %s683_s17  ;;  %17 = sbr.rel (!%p15_p2) target bundleno = 6 (0x6), region = 76 }
  0xaa   :  { %254 = vsyncpa [#allocation3], 1 }
  0xab   :  { %256 = vsyncpa [#allocation3 + $0x1], 1 }
  0xac   :  { %257 = vsyncpa [#allocation4], 1 }
  0xad   :  { %259 = vsyncpa [#allocation4 + $0x1], 1 }

</bundles_post_ra>
